<compile_context>
chip_gen: v6e
topology: v6e:2x2x1
jax: 0.10.0
libtpu: 0.0.40
codegen_flags: <defaults>
</compile_context>

<pallas_src>
import jax
import jax.numpy as jnp
from jax.experimental import pallas as pl
from jax.experimental.pallas import tpu as pltpu

_LANE = 128
_FUSED_BLOCK_BYTES = 2 * 1024 * 1024  # per-batch (C, HW) block limit for fused path


# ---------------------------------------------------------------------------
# Kernels
# ---------------------------------------------------------------------------
def _fused_kernel(x_ref, w1_ref, b1_ref, w2_ref, b2_ref, o_ref):
    # x_ref/o_ref: (C, HW_pad) whole (padded) image of one batch element.
    # w1: (Cr, C) pre-scaled by 1/HW, b1: (Cr, 1), w2: (C, Cr), b2: (C, 1) -- all f32.
    x = x_ref[...].astype(jnp.float32)
    pooled = jnp.sum(x, axis=-1, keepdims=True)                        # (C, 1)
    h = jnp.dot(w1_ref[...], pooled,
                preferred_element_type=jnp.float32) + b1_ref[...]      # (Cr, 1)
    h = jnp.maximum(h, 0.0)
    s = jnp.dot(w2_ref[...], h,
                preferred_element_type=jnp.float32) + b2_ref[...]      # (C, 1)
    s = jax.nn.sigmoid(s)
    o_ref[...] = (x * s).astype(o_ref.dtype)                           # lane broadcast


def _pool_excite_kernel(x_ref, w1_ref, b1_ref, w2_ref, b2_ref, s_ref, acc_ref):
    # Pass 1: accumulate channel sums over HW tiles, then run the tiny excite MLP.
    # x_ref: (C, T) tile; s_ref: (C, 1) output scale; acc_ref: (C, 1) f32 scratch.
    t = pl.program_id(1)

    @pl.when(t == 0)
    def _():
        acc_ref[...] = jnp.zeros_like(acc_ref)

    acc_ref[...] += jnp.sum(x_ref[...].astype(jnp.float32), axis=-1, keepdims=True)

    @pl.when(t == pl.num_programs(1) - 1)
    def _():
        pooled = acc_ref[...]                                          # (C, 1)
        h = jnp.dot(w1_ref[...], pooled,
                    preferred_element_type=jnp.float32) + b1_ref[...]  # (Cr, 1)
        h = jnp.maximum(h, 0.0)
        s = jnp.dot(w2_ref[...], h,
                    preferred_element_type=jnp.float32) + b2_ref[...]  # (C, 1)
        s_ref[...] = jax.nn.sigmoid(s)


def _scale_kernel(x_ref, s_ref, o_ref):
    # Pass 2: elementwise per-channel scale. x_ref/o_ref: (C, T); s_ref: (C, 1).
    o_ref[...] = (x_ref[...].astype(jnp.float32) * s_ref[...]).astype(o_ref.dtype)


# ---------------------------------------------------------------------------
# Wrapper
# ---------------------------------------------------------------------------
def _pick_tile(hw, t_target=1024):
    """Pick a lane tile size (multiple of 128) and the padded spatial extent."""
    if hw % _LANE == 0:
        # Largest multiple of 128 <= t_target that divides hw (no padding needed).
        tile = _LANE
        for cand in range(t_target, _LANE - 1, -_LANE):
            if hw % cand == 0:
                tile = cand
                break
        return tile, hw
    tile = min(t_target, _LANE * pl.cdiv(hw, _LANE))
    return tile, tile * pl.cdiv(hw, tile)


def fused_ca_layer(x, w1, b1, w2, b2, *, fused_block_limit=_FUSED_BLOCK_BYTES):
    """Channel attention: x * sigmoid(W2 @ relu(W1 @ mean_hw(x) + b1) + b2).

    x: (B, C, H, W); w1: (C//r, C); b1: (C//r,); w2: (C, C//r); b2: (C,).
    """
    B, C, H, W = x.shape
    HW = H * W
    Cr = w1.shape[0]

    # Hoist all weight prep out of the kernels: cast to f32, fold the 1/(H*W)
    # mean normalization into w1, reshape biases to column vectors.
    w1s = w1.astype(jnp.float32) * (1.0 / HW)        # (Cr, C)
    b1c = b1.astype(jnp.float32).reshape(Cr, 1)      # (Cr, 1)
    w2f = w2.astype(jnp.float32)                     # (C, Cr)
    b2c = b2.astype(jnp.float32).reshape(C, 1)       # (C, 1)

    hw_pad_lane = _LANE * pl.cdiv(HW, _LANE)
    use_fused = C * hw_pad_lane * x.dtype.itemsize <= fused_block_limit

    if use_fused:
        T = HW_pad = hw_pad_lane
        num_tiles = 1
    else:
        T, HW_pad = _pick_tile(HW)
        num_tiles = HW_pad // T

    x_flat = x.reshape(B, C, HW)
    if HW_pad != HW:
        # Zero padding keeps the channel sums exact and guarantees lane-dense
        # (multiple-of-128) tiles / stores.
        x_flat = jnp.pad(x_flat, ((0, 0), (0, 0), (0, HW_pad - HW)))

    weight_specs = [
        pl.BlockSpec((Cr, C), lambda b, *_: (0, 0)),
        pl.BlockSpec((Cr, 1), lambda b, *_: (0, 0)),
        pl.BlockSpec((C, Cr), lambda b, *_: (0, 0)),
        pl.BlockSpec((C, 1), lambda b, *_: (0, 0)),
    ]

    if use_fused:
        # Single pass: 1 read + 1 write of x, whole (padded) image per batch element.
        out = pl.pallas_call(
            _fused_kernel,
            out_shape=jax.ShapeDtypeStruct((B, C, HW_pad), x.dtype),
            grid_spec=pltpu.PrefetchScalarGridSpec(
                num_scalar_prefetch=0,
                grid=(B,),
                in_specs=[pl.BlockSpec((None, C, HW_pad), lambda b: (b, 0, 0))]
                + weight_specs,
                out_specs=pl.BlockSpec((None, C, HW_pad), lambda b: (b, 0, 0)),
            ),
            compiler_params=pltpu.CompilerParams(
                dimension_semantics=("parallel",)),
        )(x_flat, w1s, b1c, w2f, b2c)
    else:
        # Pass 1: channel sums over HW tiles + excite MLP -> per-channel scale.
        s = pl.pallas_call(
            _pool_excite_kernel,
            out_shape=jax.ShapeDtypeStruct((B, C, 1), jnp.float32),
            grid_spec=pltpu.PrefetchScalarGridSpec(
                num_scalar_prefetch=0,
                grid=(B, num_tiles),
                in_specs=[pl.BlockSpec((None, C, T), lambda b, t: (b, 0, t))]
                + weight_specs,
                out_specs=pl.BlockSpec((None, C, 1), lambda b, t: (b, 0, 0)),
                scratch_shapes=[pltpu.VMEM((C, 1), jnp.float32)],
            ),
            compiler_params=pltpu.CompilerParams(
                dimension_semantics=("parallel", "arbitrary")),
        )(x_flat, w1s, b1c, w2f, b2c)

        # Pass 2: elementwise scale; both axes parallel so both TCs are used
        # even when B == 1.
        out = pl.pallas_call(
            _scale_kernel,
            out_shape=jax.ShapeDtypeStruct((B, C, HW_pad), x.dtype),
            grid_spec=pltpu.PrefetchScalarGridSpec(
                num_scalar_prefetch=0,
                grid=(B, num_tiles),
                in_specs=[
                    pl.BlockSpec((None, C, T), lambda b, t: (b, 0, t)),
                    pl.BlockSpec((None, C, 1), lambda b, t: (b, 0, 0)),
                ],
                out_specs=pl.BlockSpec((None, C, T), lambda b, t: (b, 0, t)),
            ),
            compiler_params=pltpu.CompilerParams(
                dimension_semantics=("parallel", "parallel")),
        )(x_flat, s)

    if HW_pad != HW:
        out = out[:, :, :HW]
    return out.reshape(B, C, H, W)


def _reference(x, w1, b1, w2, b2):
    # Pure-JAX reference for verification.
    y = jnp.mean(x, axis=(2, 3))                       # (B, C)
    h = jnp.maximum(y @ w1.T + b1, 0.0)                # (B, Cr)
    s = jax.nn.sigmoid(h @ w2.T + b2)                  # (B, C)
    return x * s[:, :, None, None]


if __name__ == "__main__":
    B, C, H, W = 2, 16, 16, 16
    reduction = 4
    Cr = C // reduction

    key = jax.random.PRNGKey(0)
    kx, kw1, kb1, kw2, kb2 = jax.random.split(key, 5)

    x = jax.random.normal(kx, (B, C, H, W), dtype=jnp.float32)
    # 1x1 conv weights (squeezed from (out, in, 1, 1) to (out, in)).
    w1 = jax.random.normal(kw1, (Cr, C), dtype=jnp.float32) * 0.1
    b1 = jax.random.normal(kb1, (Cr,), dtype=jnp.float32) * 0.1
    w2 = jax.random.normal(kw2, (C, Cr), dtype=jnp.float32) * 0.1
    b2 = jax.random.normal(kb2, (C,), dtype=jnp.float32) * 0.1

    ref = _reference(x, w1, b1, w2, b2)

    # Small image -> fused single-pass path (1 read + 1 write of x).
    out_fused = jax.block_until_ready(fused_ca_layer(x, w1, b1, w2, b2))
    assert out_fused.shape == (B, C, H, W)
    assert jnp.allclose(out_fused, ref, atol=1e-5, rtol=1e-5), "fused path mismatch"

    # Force the HW-tiled two-pass path (used for large images / small-VMEM chips).
    out_tiled = jax.block_until_ready(
        fused_ca_layer(x, w1, b1, w2, b2, fused_block_limit=0))
    assert out_tiled.shape == (B, C, H, W)
    assert jnp.allclose(out_tiled, ref, atol=1e-5, rtol=1e-5), "tiled path mismatch"

    print("KERNEL_OK")
</pallas_src>

<mosaic_0001>
module attributes {stable_mosaic.version = 11 : i64} {
  func.func @_fused_kernel(%arg0: i32, %arg1: memref<1x16x256xf32, #tpu.memory_space<vmem>>, %arg2: memref<4x16xf32, #tpu.memory_space<vmem>>, %arg3: memref<4x1xf32, #tpu.memory_space<vmem>>, %arg4: memref<16x4xf32, #tpu.memory_space<vmem>>, %arg5: memref<16x1xf32, #tpu.memory_space<vmem>>, %arg6: memref<1x16x256xf32, #tpu.memory_space<vmem>>) attributes {dimension_semantics = [#tpu.dimension_semantics<parallel>], iteration_bounds = array<i64: 2>, scalar_prefetch = 0 : i64, scratch_operands = 0 : i64, tpu.core_type = #tpu.core_type<tc>, window_params = [{transform_indices = @transform_0, window_bounds = array<i64: 1, 16, 256>}, {pipeline_mode = #tpu.pipeline_mode<synchronous>, transform_indices = @transform_1, window_bounds = array<i64: 4, 16>}, {pipeline_mode = #tpu.pipeline_mode<synchronous>, transform_indices = @transform_2, window_bounds = array<i64: 4, 1>}, {pipeline_mode = #tpu.pipeline_mode<synchronous>, transform_indices = @transform_3, window_bounds = array<i64: 16, 4>}, {pipeline_mode = #tpu.pipeline_mode<synchronous>, transform_indices = @transform_4, window_bounds = array<i64: 16, 1>}, {transform_indices = @transform_5, window_bounds = array<i64: 1, 16, 256>}]} {
    %c0 = arith.constant 0 : index
    %c0_0 = arith.constant 0 : index
    %c0_1 = arith.constant 0 : index
    %0 = vector.load %arg1[%c0, %c0_0, %c0_1] : memref<1x16x256xf32, #tpu.memory_space<vmem>>, vector<1x16x256xf32>
    %1 = vector.shape_cast %0 : vector<1x16x256xf32> to vector<16x256xf32>
    %cst = arith.constant dense<0.000000e+00> : vector<16xf32>
    %2 = vector.multi_reduction <add>, %1, %cst [1] : vector<16x256xf32> to vector<16xf32>
    %3 = vector.shape_cast %2 : vector<16xf32> to vector<16x1xf32>
    %c0_2 = arith.constant 0 : index
    %c0_3 = arith.constant 0 : index
    %4 = vector.load %arg2[%c0_2, %c0_3] : memref<4x16xf32, #tpu.memory_space<vmem>>, vector<4x16xf32>
    %cst_4 = arith.constant dense<0.000000e+00> : vector<4x1xf32>
    %5 = tpu.matmul %4, %3, %cst_4 {dimension_numbers = #tpu.dot_dimension_numbers<[1], [0], [0], [1], [0, 0, 1, 1], [], []>} : vector<4x16xf32>, vector<16x1xf32>, vector<4x1xf32> -> vector<4x1xf32>
    %c0_5 = arith.constant 0 : index
    %c0_6 = arith.constant 0 : index
    %6 = vector.load %arg3[%c0_5, %c0_6] : memref<4x1xf32, #tpu.memory_space<vmem>>, vector<4x1xf32>
    %7 = arith.addf %5, %6 : vector<4x1xf32>
    %cst_7 = arith.constant 0.000000e+00 : f32
    %8 = vector.broadcast %cst_7 : f32 to vector<4x1xf32>
    %9 = arith.maximumf %7, %8 : vector<4x1xf32>
    %c0_8 = arith.constant 0 : index
    %c0_9 = arith.constant 0 : index
    %10 = vector.load %arg4[%c0_8, %c0_9] : memref<16x4xf32, #tpu.memory_space<vmem>>, vector<16x4xf32>
    %cst_10 = arith.constant dense<0.000000e+00> : vector<16x1xf32>
    %11 = tpu.matmul %10, %9, %cst_10 {dimension_numbers = #tpu.dot_dimension_numbers<[1], [0], [0], [1], [0, 0, 1, 1], [], []>} : vector<16x4xf32>, vector<4x1xf32>, vector<16x1xf32> -> vector<16x1xf32>
    %c0_11 = arith.constant 0 : index
    %c0_12 = arith.constant 0 : index
    %12 = vector.load %arg5[%c0_11, %c0_12] : memref<16x1xf32, #tpu.memory_space<vmem>>, vector<16x1xf32>
    %13 = arith.addf %11, %12 : vector<16x1xf32>
    %14 = arith.negf %13 : vector<16x1xf32>
    %15 = math.exp %14 : vector<16x1xf32>
    %cst_13 = arith.constant 1.000000e+00 : f32
    %16 = vector.broadcast %cst_13 : f32 to vector<16x1xf32>
    %17 = arith.addf %16, %15 : vector<16x1xf32>
    %18 = arith.divf %16, %17 : vector<16x1xf32>
    %19 = vector.broadcast %18 : vector<16x1xf32> to vector<16x256xf32>
    %20 = arith.mulf %1, %19 : vector<16x256xf32>
    %c0_14 = arith.constant 0 : index
    %c0_15 = arith.constant 0 : index
    %c0_16 = arith.constant 0 : index
    %21 = vector.load %arg6[%c0_14, %c0_15, %c0_16] : memref<1x16x256xf32, #tpu.memory_space<vmem>>, vector<1x16x256xf32>
    %22 = vector.shape_cast %21 : vector<1x16x256xf32> to vector<16x256xf32>
    %23 = vector.shape_cast %20 : vector<16x256xf32> to vector<1x16x256xf32>
    tpu.vector_store %arg6[%c0_14, %c0_15, %c0_16], %23 {strides = array<i32>} : memref<1x16x256xf32, #tpu.memory_space<vmem>>, vector<1x16x256xf32>,
    return
  }
  func.func @transform_0(%arg0: i32) -> (i32, i32, i32) {
    %c0_i32 = arith.constant 0 : i32
    %c0_i32_0 = arith.constant 0 : i32
    %c0_i32_1 = arith.constant 0 : i32
    return %arg0, %c0_i32, %c0_i32_0 : i32, i32, i32
  }
  func.func @transform_1(%arg0: i32) -> (i32, i32) {
    %c0_i32 = arith.constant 0 : i32
    %c0_i32_0 = arith.constant 0 : i32
    %c0_i32_1 = arith.constant 0 : i32
    return %c0_i32, %c0_i32_0 : i32, i32
  }
  func.func @transform_2(%arg0: i32) -> (i32, i32) {
    %c0_i32 = arith.constant 0 : i32
    %c0_i32_0 = arith.constant 0 : i32
    %c0_i32_1 = arith.constant 0 : i32
    return %c0_i32, %c0_i32_0 : i32, i32
  }
  func.func @transform_3(%arg0: i32) -> (i32, i32) {
    %c0_i32 = arith.constant 0 : i32
    %c0_i32_0 = arith.constant 0 : i32
    %c0_i32_1 = arith.constant 0 : i32
    return %c0_i32, %c0_i32_0 : i32, i32
  }
  func.func @transform_4(%arg0: i32) -> (i32, i32) {
    %c0_i32 = arith.constant 0 : i32
    %c0_i32_0 = arith.constant 0 : i32
    %c0_i32_1 = arith.constant 0 : i32
    return %c0_i32, %c0_i32_0 : i32, i32
  }
  func.func @transform_5(%arg0: i32) -> (i32, i32, i32) {
    %c0_i32 = arith.constant 0 : i32
    %c0_i32_0 = arith.constant 0 : i32
    %c0_i32_1 = arith.constant 0 : i32
    return %arg0, %c0_i32, %c0_i32_0 : i32, i32, i32
  }
}

</mosaic_0001>

<bundles_post_ra>
// kernel: tpu_custom_call.1
= control target key start
LH: loop header
LB: loop body
LE: loop exit
PB: predicated region body
PF: predicated region fallthrough
CT: control target
= control target key end

     0   :  { %10 = vsyncpa [#allocation3], 0  ;;  %s957_s0 = inlined_call_operand.hbm [shape: f32[2,16,256], index: 0, kind: input, shape index: {}]   ;;  %s958_s1 = inlined_call_operand.vmem [shape: f32[4,16], index: 1, kind: input, shape index: {}]   ;;  %s959_s2 = inlined_call_operand.vmem [shape: f32[4,1], index: 2, kind: input, shape index: {}]   ;;  %s960_s3 = inlined_call_operand.vmem [shape: f32[16,4], index: 3, kind: input, shape index: {}]   ;;  %s961_s4 = inlined_call_operand.vmem [shape: f32[16,1], index: 4, kind: input, shape index: {}]   ;;  %s962_s5 = inlined_call_operand.hbm [shape: f32[2,16,256], index: 5, kind: output, shape index: {}]  }
   0x1   :  { %12 = vsyncpa [#allocation3 + $0x1], 0 }
   0x2   :  { %13 = vsyncpa [#allocation4], 0 }
   0x3   :  { %15 = vsyncpa [#allocation4 + $0x1], 0  ;;  %s773_s18 = smov 0   ;;  %s775_s19 = smov 0  }
   0x4   :  { %s777_s20 = smov 0   ;;  %s779_s21 = smov 0  }
   0x5 LB: > { %s794_s22 = sadd.s32 4294967295, %s732_s21   ;;  %s537_s23 = sadd.s32 4294967294, %s732_s21   ;;  %s732_s21 = sphi %s779_s21, %s977_s21   ;;  %s728_s20 = sphi %s777_s20, %s976_s20   ;;  %s724_s19 = sphi %s775_s19, %s975_s19   ;;  %s720_s18 = sphi %s773_s18, %s974_s18  }
   0x6   : > { %s798_s24 = sadd.s32 1, %s732_s21   ;;  %s28_s25 = sadd.s32 1, %s728_s20 }
   0x7   : > { %s25_s26 = ssub.s32 %s732_s21, %s798_s24  ;;  %p35_p0 = scmp.ne.s32.totalorder %s728_s20, %s724_s19 }
   0x8   : > { %p26_p1 = scmp.eq.s32.totalorder %s25_s26, 0  ;;  %p36_p2 = scmp.eq.s32.totalorder %s732_s21, 0 }
   0x9   : > { %p41_p3 = scmp.ne.s32.totalorder %s724_s19, %s720_s18  ;;  %p42_p4 = scmp.eq.s32.totalorder %s794_s22, 0 }
   0xa   : > { %s810_s27 = scalar_select %p26_p1, %s728_s20, %s28_s25  }
   0xb   : > { %p812_p5 = por %p36_p2, %p35_p0  ;;  %p816_p6 = por %p42_p4, %p41_p3 }
   0xc   : > { %p149_p7 = scmp.eq.s32.totalorder %s794_s22, 1  ;;  %p155_p8 = scmp.eq.s32.totalorder %s537_s23, 1 }
   0xd   : > { %s966_s29 = scalar_select %p816_p6, 1, 0 }
   0xe   : > { %p589_p10 = scmp.lt.s32.totalorder %s732_s21, 2  ;;  %p823_p11 = por %p149_p7, %p35_p0 }
   0xf   : > { %p827_p12 = por %p155_p8, %p41_p3  ;;  %s187_s7 = sand.u32 1, %s728_s20  }
  0x10   : > { %s967_s30 = scalar_select %p823_p11, 1, 0 }
  0x11   : > { %s968_s6 = scalar_select %p827_p12, 1, 0 }
  0x12   : > { %s557_s8 = sshll.u32 %s732_s21, 9  ;;  %s540_s9 = sshll.u32 %s187_s7, 5 }
  0x13   : > { %s836_s12 = scalar_lea.hbm %s957_s0, %s557_s8  ;;  %s191_s13 = scalar_lea.vmem [#allocation2], %s540_s9 }
  0x14   : > { %s198_s14 = sshll.u32 %s191_s13, 4  ;;  %p840_p13 = pnand %p589_p10, %p812_p5  ;;  %s844_s14 = int_to_ptr.vmem [resolvable:$true] %s198_s14 }
  0x15   : > { %s846_s16 = scalar_lea.sflag [#allocation3], %s187_s7  ;;  %s640_s17 = scalar_lea.hbm %s836_s12, 512 }
  0x16   : > { %p641_p0 = scmp.ne.s32.totalorder %s836_s12, %s640_s17  ;;  %p642_p1 = pneg %p840_p13 }
  0x17   : > { %s645_s26 = scalar_lea.hbm %s957_s0, 1024  ;;  %p646_p4 = scmp.lt.s32.totalorder %s836_s12, %s957_s0 }
  0x18   : > { %p643_p2 = pnand %p642_p1, %p641_p0  ;;  %p647_p5 = scmp.lt.s32.totalorder %s645_s26, %s640_s17 }
  0x1a   : > { %p644_p3 = pneg %p643_p2  ;;  %p648_p7 = por %p647_p5, %p646_p4 }
  0x1c   : > { %p649_p8 = pnand %p648_p7, %p644_p3 }
  0x1e   : > { %652 = shalt.err (!%p649_p8)
}
  0x1f   : > { %s653_s7 = scalar_lea.vmem %s844_s14, 512  ;;  %s734_s9 = smov [#allocation2]  }
  0x20   : > { %p654_p10 = scmp.ne.s32.totalorder %s844_s14, %s653_s7  ;;  %s658_s10 = sshll.u32 %s734_s9, 4  ;;  %s659_s10 = int_to_ptr.vmem [resolvable:$false] %s658_s10 }
  0x21   : > { %s660_s11 = scalar_lea.vmem %s659_s10, 1024  ;;  %p661_p2 = scmp.lt.s32.totalorder %s844_s14, %s659_s10 }
  0x22   : > { %p656_p9 = pnand %p654_p10, %p642_p1  ;;  %p662_p12 = scmp.lt.s32.totalorder %s660_s11, %s653_s7 }
  0x24   : > { %p657_p0 = pneg %p656_p9  ;;  %p663_p11 = por %p662_p12, %p661_p2 }
  0x26   : > { %p664_p6 = pnand %p663_p11, %p657_p0 }
  0x28   : > { %667 = shalt.err (!%p664_p6)
}
  0x29   : > { %s735_s13 = smov 256   ;;  %s736_s17 = smov 16  }
  0x2a   : > { %584 = dma.hbm_to_vmem [thread:$0]  (!%p840_p13), %s836_s12, 512, %s844_s14, %s846_s16, %s735_s13, %s735_s13, %s736_s17  }
  0x2b   : > { %p543_p9 = scmp.ge.s32.totalorder %s732_s21, 1  ;;  %p206_p1 = scmp.lt.s32.totalorder %s732_s21, 3 }
  0x2d   : > { %p207_p3 = pnand %p543_p9, %p206_p1 }
  0x2e   : > { %s870_s23 = sand.u32 (!%p207_p3), 1, %s724_s19   ;;  %p970_p6 = scmp.ne.s32.totalorder (!%p207_p3), %s966_s29, 0 }
  0x2f   : > { %210 = sbr.rel (%p207_p3) target bundleno = 771 (0x303), region = 40  ;;  %s544_s25 = sshll.u32 (!%p207_p3), %s870_s23, 5 }
  0x30   : > { %s213_s26 = scalar_lea.sflag (!%p207_p3), [#allocation3], %s870_s23  ;;  %s216_s28 = scalar_lea.vmem (!%p207_p3), [#allocation2], %s544_s25 }
  0x34   : > { %711 = dma.done.wait (%p970_p6), %s213_s26, 512  }
  0x35   : > { %713 = vsyncadd (%p970_p6), %s213_s26, 4294966784  ;;  %v737_v0 = vmov 0.0   ;;  %v880_v1 = vld [vmem:[%s216_s28 + $0x10] sm:$0xff]  ;;  %v882_v2 = vld [vmem:[%s216_s28 + $0x18] sm:$0xff]  ;;  %vm738_vm0 = vmmov 0   ;;  %vm255_vm1 = vcmask 130048  }
  0x36   : > { %565 = vmatprep.subr.mxu0 %v737_v0  ;;  %v243_v3 = vld [vmem:[%s216_s28] sm:$0xff]  ;;  %v250_v4 = vadd.f32 %v882_v2, %v880_v1  ;;  %v244_v5 = vld [vmem:[%s216_s28 + $0x8] sm:$0xff]  ;;  %569 = vmatprep.mubr.msk.f32.mxu0 %vm738_vm0, %v737_v0  ;;  %vm334_vm2 = vcmask 31744   ;;  %vm341_vm3 = vcmask 1043456   ;;  %v739_v17 = vmov 0   ;;  %s242_s26 = scalar_lea.vmem [#allocation5], %s544_s25 }
  0x37   : > { %v247_v6 = vadd.f32 %v244_v5, %v243_v3  ;;  %v253_v8 = vld [vmem:[%s958_s1] sm:$0xf]  ;;  %v331_v16 = vld [vmem:[%s960_s3 + $0x8] sm:$0xff]  ;;  %630 = vset.pattern.permute.xlu1 %v739_v17  ;;  %631 = vset.pattern.permute.xlu0 %v739_v17  ;;  %s464_s28 = sshll.u32 %s242_s26, 4  ;;  %s558_s29 = sshll.u32 %s794_s22, 9  ;;  %s907_s28 = int_to_ptr.vmem [resolvable:$true] %s464_s28 }
  0x38   : > { %251 = vadd.xlane.f32.xlu0 %v250_v4  ;;  %v330_v10 = vld [vmem:[%s960_s3] sm:$0xff]  ;;  %v333_v18 = vld [vmem:[%s961_s4 + $0x8] sm:$0xff]  ;;  %s912_s15 = scalar_lea.hbm %s962_s5, %s558_s29  ;;  %s451_s22 = scalar_lea.sflag [#allocation4], %s870_s23 }
  0x39   : > { %574 = vmatprep.mubr.msk.f32.mxu1 %vm334_vm2, %v330_v10  ;;  %v254_v11 = vld [vmem:[%s959_s2] sm:$0xf]  ;;  %s668_s25 = scalar_lea.vmem %s907_s28, 512  ;;  %p971_p12 = scmp.ne.s32.totalorder %s967_s30, 0 }
  0x3a   : > { %v332_v20 = vld [vmem:[%s961_s4] sm:$0xff]  ;;  %p669_p11 = scmp.ne.s32.totalorder %s907_s28, %s668_s25  ;;  %s740_s16 = smov [#allocation5]  }
  0x3b   : > { %s672_s8 = sshll.u32 %s740_s16, 4  ;;  %s673_s8 = int_to_ptr.vmem [resolvable:$false] %s672_s8 }
  0x3c   : > { %248 = vadd.xlane.f32.xlu0 %v247_v6  ;;  %p670_p13 = pnand %p669_p11, %p971_p12  ;;  %s674_s7 = scalar_lea.vmem %s673_s8, 1024 }
  0x3d   : > { %p675_p5 = scmp.lt.s32.totalorder %s907_s28, %s673_s8  ;;  %p676_p7 = scmp.lt.s32.totalorder %s674_s7, %s668_s25 }
  0x3e   : > { %p671_p4 = pneg %p670_p13 }
  0x3f   : > { %p677_p8 = por %p676_p7, %p675_p5 }
  0x41   : > { %p678_p10 = pnand %p677_p8, %p671_p4 }
  0xc1   : > { %v252_v7 = vpop.xlane.xlu0 %251 }
  0xc2   : > { %566 = vmatpush3.msra.mxu0 %v252_v7 }
  0xc3   : > { %567 = vmatprep.subr.mxu0 %v737_v0 }
  0xc5   : > { %v249_v9 = vpop.xlane.xlu0 %248 }
  0xc6   : > { %568 = vmatpush3.msra.mxu0 %v249_v9 }
  0xc7   : > { %570 = vmatmul.mubr.msk.f32.vlgmr.msra.gmra.mxu0 %vm255_vm1, %v253_v8 }
 0x187   : > { %v325_v12 = vpop.f32.mrf.mxu0 }
 0x188   : > { %v326_v13 = vadd.f32 %v325_v12, %v254_v11 }
 0x189   : > { %v571_v14 = vpop.f32.mrf.mxu0 }
 0x18a   : > { %v329_v15 = vmax.f32 %v326_v13, 0.0 }
 0x18c   : > { %572 = vmatprep.subr.msk.mxu1 %vm341_vm3, %v329_v15 }
 0x18d   : > { %573 = vmatpush3.msk.msra.mxu1 %vm341_vm3, %v329_v15 }
 0x18e   : > { %575 = vmatmul.mubr.msk.f32.vlgmr.msra.gmra.mxu1 %vm334_vm2, %v331_v16 }
 0x24e   : > { %v576_v19 = vpop.f32.mrf.mxu1 }
 0x24f   : > { %v417_v21 = vadd.f32 %v576_v19, %v333_v18 }
 0x250   : > { %v411_v22 = vpop.f32.mrf.mxu1 }
 0x251   : > { %v551_v23 = vmul.f32 -1.442695, %v417_v21  ;;  %v412_v24 = vadd.f32 %v411_v22, %v332_v20 }
 0x253   : > { %v550_v25 = vmul.f32 -1.442695, %v412_v24  ;;  %632 = vpow2.f32 %v551_v23 }
 0x255   : > { %634 = vpow2.f32 %v550_v25 }
 0x260   : > { %v633_v26 = vpop.eup %632 }
 0x261   : > { %v427_v29 = vadd.f32 1.0, %v633_v26 }
 0x262   : > { %v635_v27 = vpop.eup %634 }
 0x263   : > { %v426_v28 = vadd.f32 1.0, %v635_v27 }
 0x265   : > { %636 = vrcp.f32 %v426_v28 }
 0x266   : > { %638 = vrcp.f32 %v427_v29 }
 0x272   : > { %v637_v30 = vpop.eup %636 }
 0x273   : > { %434 = vperm.xlu1 %630, %v637_v30   ;;  %v639_v31 = vpop.eup %638 }
 0x277   : > { %439 = vperm.xlu1 %630, %v639_v31  }
 0x2ee   : > { %v435_v32 = vpop.permute.xlu1 %434 }
 0x2ef   : > { %v442_v33 = vmul.f32 %v435_v32, %v243_v3  ;;  %v443_v34 = vmul.f32 %v435_v32, %v244_v5 }
 0x2f1   : > { %446 = vst [vmem:[%s242_s26] sm:$0xff] %v442_v33  ;;  %447 = vst [vmem:[%s242_s26 + $0x8] sm:$0xff] %v443_v34 }
 0x2f2   : > { %v440_v35 = vpop.permute.xlu1 %439 }
 0x2f3   : > { %v444_v36 = vmul.f32 %v440_v35, %v880_v1  ;;  %v445_v37 = vmul.f32 %v440_v35, %v882_v2 }
 0x2f5   : > { %448 = vst [vmem:[%s242_s26 + $0x10] sm:$0xff] %v444_v36  ;;  %449 = vst [vmem:[%s242_s26 + $0x18] sm:$0xff] %v445_v37 }
 0x2f6   : > { %681 = shalt.err (!%p678_p10)
}
 0x2f7   : > { %s682_s9 = scalar_lea.hbm %s912_s15, 512  ;;  %s686_s13 = scalar_lea.hbm %s962_s5, 1024 }
 0x2f8   : > { %p683_p0 = scmp.ne.s32.totalorder %s912_s15, %s682_s9  ;;  %p687_p1 = scmp.lt.s32.totalorder %s912_s15, %s962_s5 }
 0x2f9   : > { %p688_p3 = scmp.lt.s32.totalorder %s686_s13, %s682_s9 }
 0x2fa   : > { %p684_p2 = pnand %p683_p0, %p971_p12 }
 0x2fb   : > { %p689_p6 = por %p688_p3, %p687_p1 }
 0x2fc   : > { %p685_p9 = pneg %p684_p2 }
 0x2fe   : > { %p690_p11 = pnand %p689_p6, %p685_p9 }
 0x300   : > { %693 = shalt.err (!%p690_p11)
}
 0x301   : > { %s741_s29 = smov 256   ;;  %s742_s12 = smov 16  }
 0x302   : > { %579 = dma.vmem_to_hbm [thread:$0]  (%p971_p12), %s907_s28, 512, %s912_s15, %s451_s22, %s741_s29, %s741_s29, %s742_s12  }
 0x303 PF: > { %s479_s14 = sand.u32 1, %s720_s18   ;;  %p972_p13 = scmp.ne.s32.totalorder %s968_s6, 0 }
 0x304   : > { %p973_p4 = scmp.ge.s32.totalorder %s732_s21, 2  ;;  %s480_s25 = scalar_lea.sflag [#allocation4], %s479_s14 }
 0x306   : > { %p586_p5 = pnand %p973_p4, %p972_p13 }
 0x308   : > { %p587_p7 = pneg %p586_p5 }
 0x30a   : > { %715 = dma.done.wait (%p587_p7), %s480_s25, 512  }
 0x30b   : > { %717 = vsyncadd (%p587_p7), %s480_s25, 4294966784  ;;  %p18_p8 = scmp.ge.s32.totalorder %s798_s24, 4   ;;  %s974_s18 = smov %s724_s19 }
 0x30c   : > { %s975_s19 = smov %s728_s20  ;;  %s976_s20 = smov %s810_s27 }
 0x30d   : > { %s977_s21 = smov %s798_s24  ;;  %20 = sbr.rel (!%p18_p8) target bundleno = 5 (0x5), region = 85 }
 0x312   :  { %485 = vsyncpa [#allocation3], 1 }
 0x313   :  { %487 = vsyncpa [#allocation3 + $0x1], 1 }
 0x314   :  { %488 = vsyncpa [#allocation4], 1 }
 0x315   :  { %490 = vsyncpa [#allocation4 + $0x1], 1 }

</bundles_post_ra>
